<compile_context>
chip_gen: v6e
topology: v6e:2x2x1
jax: 0.10.0
libtpu: 0.0.40
codegen_flags: <defaults>
</compile_context>

<pallas_src>
import jax
import jax.numpy as jnp
from jax.experimental import pallas as pl
from jax.experimental.pallas import tpu as pltpu

LANE = 128
BN_EPS = 1e-5
TM_MAX = 512          # safe on v5e/v6e (128 MiB VMEM) and v7x (64 MiB VMEM)


def _round_up(n, m):
    return ((n + m - 1) // m) * m


def _choose_tm(B, tm_max=TM_MAX):
    """Adaptive batch tile: multiple of 16 (bf16 sublane pack), <= tm_max,
    split into two balanced tiles when possible so v7x's 2nd TC gets work."""
    Bp = _round_up(max(B, 1), 16)
    if Bp > tm_max:
        return tm_max
    if Bp >= 32:                       # two balanced tiles for megacore / 2 TCs
        return _round_up(Bp // 2, 16)
    return Bp                          # tiny batch: single minimal tile


# ---------------------------------------------------------------------------
# Kernel
# ---------------------------------------------------------------------------
def mlp_kernel(x_ref,
               w1_ref, c1_ref,
               w2_ref, c2_ref,
               w3_ref, c3_ref,
               w4_ref, b4_ref,
               o_ref):
    # In-kernel cast of the f32 input (saves a wrapper-side HBM pass).
    x = x_ref[...].astype(jnp.bfloat16)

    # fc1 + bn1 (folded) -> relu   (dropout1 = identity in eval)
    h = jnp.dot(x, w1_ref[...], preferred_element_type=jnp.float32)
    h = jnp.maximum(h + c1_ref[...], 0.0).astype(jnp.bfloat16)

    # fc2 + bn2 (folded) -> relu   (dropout2 = identity in eval)
    h = jnp.dot(h, w2_ref[...], preferred_element_type=jnp.float32)
    h = jnp.maximum(h + c2_ref[...], 0.0).astype(jnp.bfloat16)

    # fc3 + bn3 (folded) -> relu   (dropout3 = identity in eval)
    h = jnp.dot(h, w3_ref[...], preferred_element_type=jnp.float32)
    h = jnp.maximum(h + c3_ref[...], 0.0).astype(jnp.bfloat16)

    # fc4 (no activation); lane-dense 128-wide bf16 store (sliced by caller).
    out = jnp.dot(h, w4_ref[...], preferred_element_type=jnp.float32) + b4_ref[...]
    o_ref[...] = out.astype(o_ref.dtype)


# ---------------------------------------------------------------------------
# Parameters: raw (PyTorch-shaped) and folded/padded kernel params
# ---------------------------------------------------------------------------
def make_raw_params(key, input_dim, output_dim, dtype=jnp.float32):
    """Deterministic synthetic params matching Net.__init__ shapes (PyTorch layout)."""
    dims = [input_dim, 128, 64, 32, output_dim]
    raw = {}
    for layer in range(1, 5):
        din, dout = dims[layer - 1], dims[layer]
        key, kw, kb = jax.random.split(key, 3)
        raw[f"W{layer}"] = 0.05 * jax.random.normal(kw, (dout, din), dtype)  # (out, in)
        raw[f"b{layer}"] = 0.05 * jax.random.normal(kb, (dout,), dtype)
    for layer in range(1, 4):  # bn1..bn3 over 128, 64, 32
        d = dims[layer]
        key, kg, kb, km, kv = jax.random.split(key, 5)
        raw[f"g{layer}"] = 1.0 + 0.1 * jax.random.normal(kg, (d,), dtype)
        raw[f"be{layer}"] = 0.1 * jax.random.normal(kb, (d,), dtype)
        raw[f"m{layer}"] = 0.1 * jax.random.normal(km, (d,), dtype)
        raw[f"v{layer}"] = 1.0 + 0.1 * jax.random.uniform(kv, (d,), dtype)
    return raw


def fold_and_pad_params(raw, input_dim, output_dim):
    """Fold BN+bias into weights, transpose to (in,out), zero-pad features to 128."""
    dims = [input_dim, 128, 64, 32, output_dim]
    padded = [input_dim, 128, 128, 128, _round_up(output_dim, LANE)]
    kp = {}
    for layer in range(1, 5):
        din, dout = dims[layer - 1], dims[layer]
        pin, pout = padded[layer - 1], padded[layer]
        wt = raw[f"W{layer}"].T                      # (in, out)
        if layer <= 3:
            s = raw[f"g{layer}"] / jnp.sqrt(raw[f"v{layer}"] + BN_EPS)
            w_fold = wt * s[None, :]
            c_fold = raw[f"b{layer}"] * s + raw[f"be{layer}"] - raw[f"m{layer}"] * s
            c_key = f"c{layer}"
        else:
            w_fold = wt
            c_fold = raw[f"b{layer}"]
            c_key = "b4"
        w_pad = jnp.pad(w_fold, ((0, pin - din), (0, pout - dout)))
        c_pad = jnp.pad(c_fold, ((0, pout - dout),)).reshape(1, pout)
        kp[f"w{layer}"] = w_pad.astype(jnp.bfloat16)
        kp[c_key] = c_pad.astype(jnp.float32)
    return kp


# ---------------------------------------------------------------------------
# Wrapper
# ---------------------------------------------------------------------------
def net_forward(x, kp, output_dim, tm=None, out_dtype=jnp.bfloat16,
                slice_output=True):
    B, din = x.shape
    pout = kp["w4"].shape[1]

    if tm is None:
        tm = _choose_tm(B)
    n_tiles = pl.cdiv(max(B, 1), tm)
    M = n_tiles * tm

    # Input stays f32; the kernel casts it.  Only the (at most tm-1) ragged
    # rows are padded on the host — at adaptive tm this is <= 15 rows.
    x_in = x if M == B else jnp.pad(x, ((0, M - B), (0, 0)))

    def resident(a):  # whole array, constant block -> stays in VMEM across tiles
        return pl.BlockSpec(a.shape, lambda i: (0, 0))

    args = (x_in,
            kp["w1"], kp["c1"],
            kp["w2"], kp["c2"],
            kp["w3"], kp["c3"],
            kp["w4"], kp["b4"])
    in_specs = [pl.BlockSpec((tm, din), lambda i: (i, 0))] + \
               [resident(a) for a in args[1:]]

    out = pl.pallas_call(
        mlp_kernel,
        out_shape=jax.ShapeDtypeStruct((M, pout), out_dtype),
        grid=(n_tiles,),
        in_specs=in_specs,
        out_specs=pl.BlockSpec((tm, pout), lambda i: (i, 0)),
        compiler_params=pltpu.CompilerParams(
            dimension_semantics=("parallel",)),
    )(*args)

    if slice_output:
        return out[:B, :output_dim]
    return out  # padded (M, 128) lane-dense slab; caller slices lazily


# ---------------------------------------------------------------------------
# References
# ---------------------------------------------------------------------------
def net_forward_ref_f32(x, raw):
    """Pure f32 reference with exact PyTorch eval semantics."""
    h = x
    for layer in range(1, 4):
        h = h @ raw[f"W{layer}"].T + raw[f"b{layer}"]
        s = raw[f"g{layer}"] / jnp.sqrt(raw[f"v{layer}"] + BN_EPS)
        h = jnp.maximum(h * s + (raw[f"be{layer}"] - raw[f"m{layer}"] * s), 0.0)
    return h @ raw["W4"].T + raw["b4"]


def net_forward_ref_bf16(x, kp, output_dim, out_dtype=jnp.bfloat16):
    """Plain-JAX reference matching the kernel's bf16/f32 math."""
    h = x.astype(jnp.bfloat16)
    for layer in range(1, 4):
        h = jnp.dot(h, kp[f"w{layer}"], preferred_element_type=jnp.float32)
        h = jnp.maximum(h + kp[f"c{layer}"], 0.0).astype(jnp.bfloat16)
    out = jnp.dot(h, kp["w4"], preferred_element_type=jnp.float32) + kp["b4"]
    return out.astype(out_dtype)[:, :output_dim]


# ---------------------------------------------------------------------------
if __name__ == "__main__":
    key = jax.random.PRNGKey(0)
    batch, input_dim, output_dim = 8, 32, 16

    key, kx, kparam = jax.random.split(key, 3)
    x = jax.random.normal(kx, (batch, input_dim), jnp.float32)

    raw = make_raw_params(kparam, input_dim, output_dim)
    kparams = fold_and_pad_params(raw, input_dim, output_dim)

    out = net_forward(x, kparams, output_dim)
    jax.block_until_ready(out)

    assert out.shape == (batch, output_dim)

    out_f32 = out.astype(jnp.float32)

    ref_bf = net_forward_ref_bf16(x, kparams, output_dim).astype(jnp.float32)
    assert jnp.allclose(out_f32, ref_bf, atol=1e-2, rtol=1e-2), \
        "mismatch vs bf16 reference"

    ref_f32 = net_forward_ref_f32(x, raw)
    assert float(jnp.max(jnp.abs(out_f32 - ref_f32))) < 0.1, \
        "mismatch vs f32 reference"

    print("KERNEL_OK")
</pallas_src>

<mosaic_0001>
module attributes {stable_mosaic.version = 11 : i64} {
  func.func @mlp_kernel(%arg0: i32, %arg1: memref<16x32xf32, #tpu.memory_space<vmem>>, %arg2: memref<32x128xbf16, #tpu.memory_space<vmem>>, %arg3: memref<1x128xf32, #tpu.memory_space<vmem>>, %arg4: memref<128x128xbf16, #tpu.memory_space<vmem>>, %arg5: memref<1x128xf32, #tpu.memory_space<vmem>>, %arg6: memref<128x128xbf16, #tpu.memory_space<vmem>>, %arg7: memref<1x128xf32, #tpu.memory_space<vmem>>, %arg8: memref<128x128xbf16, #tpu.memory_space<vmem>>, %arg9: memref<1x128xf32, #tpu.memory_space<vmem>>, %arg10: memref<16x128xbf16, #tpu.memory_space<vmem>>) attributes {dimension_semantics = [#tpu.dimension_semantics<parallel>], iteration_bounds = array<i64: 1>, scalar_prefetch = 0 : i64, scratch_operands = 0 : i64, tpu.core_type = #tpu.core_type<tc>, window_params = [{transform_indices = @transform_0, window_bounds = array<i64: 16, 32>}, {pipeline_mode = #tpu.pipeline_mode<synchronous>, transform_indices = @transform_1, window_bounds = array<i64: 32, 128>}, {pipeline_mode = #tpu.pipeline_mode<synchronous>, transform_indices = @transform_2, window_bounds = array<i64: 1, 128>}, {pipeline_mode = #tpu.pipeline_mode<synchronous>, transform_indices = @transform_3, window_bounds = array<i64: 128, 128>}, {pipeline_mode = #tpu.pipeline_mode<synchronous>, transform_indices = @transform_4, window_bounds = array<i64: 1, 128>}, {pipeline_mode = #tpu.pipeline_mode<synchronous>, transform_indices = @transform_5, window_bounds = array<i64: 128, 128>}, {pipeline_mode = #tpu.pipeline_mode<synchronous>, transform_indices = @transform_6, window_bounds = array<i64: 1, 128>}, {pipeline_mode = #tpu.pipeline_mode<synchronous>, transform_indices = @transform_7, window_bounds = array<i64: 128, 128>}, {pipeline_mode = #tpu.pipeline_mode<synchronous>, transform_indices = @transform_8, window_bounds = array<i64: 1, 128>}, {transform_indices = @transform_9, window_bounds = array<i64: 16, 128>}]} {
    %c0 = arith.constant 0 : index
    %c0_0 = arith.constant 0 : index
    %0 = vector.load %arg1[%c0, %c0_0] : memref<16x32xf32, #tpu.memory_space<vmem>>, vector<16x32xf32>
    %1 = arith.truncf %0 : vector<16x32xf32> to vector<16x32xbf16>
    %c0_1 = arith.constant 0 : index
    %c0_2 = arith.constant 0 : index
    %2 = vector.load %arg2[%c0_1, %c0_2] : memref<32x128xbf16, #tpu.memory_space<vmem>>, vector<32x128xbf16>
    %cst = arith.constant dense<0.000000e+00> : vector<16x128xf32>
    %3 = tpu.matmul %1, %2, %cst {dimension_numbers = #tpu.dot_dimension_numbers<[1], [0], [0], [1], [0, 0, 1, 1], [], []>} : vector<16x32xbf16>, vector<32x128xbf16>, vector<16x128xf32> -> vector<16x128xf32>
    %c0_3 = arith.constant 0 : index
    %c0_4 = arith.constant 0 : index
    %4 = vector.load %arg3[%c0_3, %c0_4] : memref<1x128xf32, #tpu.memory_space<vmem>>, vector<1x128xf32>
    %5 = vector.broadcast %4 : vector<1x128xf32> to vector<16x128xf32>
    %6 = arith.addf %3, %5 : vector<16x128xf32>
    %cst_5 = arith.constant 0.000000e+00 : f32
    %7 = vector.broadcast %cst_5 : f32 to vector<16x128xf32>
    %8 = arith.maximumf %6, %7 : vector<16x128xf32>
    %9 = arith.truncf %8 : vector<16x128xf32> to vector<16x128xbf16>
    %c0_6 = arith.constant 0 : index
    %c0_7 = arith.constant 0 : index
    %10 = vector.load %arg4[%c0_6, %c0_7] : memref<128x128xbf16, #tpu.memory_space<vmem>>, vector<128x128xbf16>
    %cst_8 = arith.constant dense<0.000000e+00> : vector<16x128xf32>
    %11 = tpu.matmul %9, %10, %cst_8 {dimension_numbers = #tpu.dot_dimension_numbers<[1], [0], [0], [1], [0, 0, 1, 1], [], []>} : vector<16x128xbf16>, vector<128x128xbf16>, vector<16x128xf32> -> vector<16x128xf32>
    %c0_9 = arith.constant 0 : index
    %c0_10 = arith.constant 0 : index
    %12 = vector.load %arg5[%c0_9, %c0_10] : memref<1x128xf32, #tpu.memory_space<vmem>>, vector<1x128xf32>
    %13 = vector.broadcast %12 : vector<1x128xf32> to vector<16x128xf32>
    %14 = arith.addf %11, %13 : vector<16x128xf32>
    %cst_11 = arith.constant 0.000000e+00 : f32
    %15 = vector.broadcast %cst_11 : f32 to vector<16x128xf32>
    %16 = arith.maximumf %14, %15 : vector<16x128xf32>
    %17 = arith.truncf %16 : vector<16x128xf32> to vector<16x128xbf16>
    %c0_12 = arith.constant 0 : index
    %c0_13 = arith.constant 0 : index
    %18 = vector.load %arg6[%c0_12, %c0_13] : memref<128x128xbf16, #tpu.memory_space<vmem>>, vector<128x128xbf16>
    %cst_14 = arith.constant dense<0.000000e+00> : vector<16x128xf32>
    %19 = tpu.matmul %17, %18, %cst_14 {dimension_numbers = #tpu.dot_dimension_numbers<[1], [0], [0], [1], [0, 0, 1, 1], [], []>} : vector<16x128xbf16>, vector<128x128xbf16>, vector<16x128xf32> -> vector<16x128xf32>
    %c0_15 = arith.constant 0 : index
    %c0_16 = arith.constant 0 : index
    %20 = vector.load %arg7[%c0_15, %c0_16] : memref<1x128xf32, #tpu.memory_space<vmem>>, vector<1x128xf32>
    %21 = vector.broadcast %20 : vector<1x128xf32> to vector<16x128xf32>
    %22 = arith.addf %19, %21 : vector<16x128xf32>
    %cst_17 = arith.constant 0.000000e+00 : f32
    %23 = vector.broadcast %cst_17 : f32 to vector<16x128xf32>
    %24 = arith.maximumf %22, %23 : vector<16x128xf32>
    %25 = arith.truncf %24 : vector<16x128xf32> to vector<16x128xbf16>
    %c0_18 = arith.constant 0 : index
    %c0_19 = arith.constant 0 : index
    %26 = vector.load %arg8[%c0_18, %c0_19] : memref<128x128xbf16, #tpu.memory_space<vmem>>, vector<128x128xbf16>
    %cst_20 = arith.constant dense<0.000000e+00> : vector<16x128xf32>
    %27 = tpu.matmul %25, %26, %cst_20 {dimension_numbers = #tpu.dot_dimension_numbers<[1], [0], [0], [1], [0, 0, 1, 1], [], []>} : vector<16x128xbf16>, vector<128x128xbf16>, vector<16x128xf32> -> vector<16x128xf32>
    %c0_21 = arith.constant 0 : index
    %c0_22 = arith.constant 0 : index
    %28 = vector.load %arg9[%c0_21, %c0_22] : memref<1x128xf32, #tpu.memory_space<vmem>>, vector<1x128xf32>
    %29 = vector.broadcast %28 : vector<1x128xf32> to vector<16x128xf32>
    %30 = arith.addf %27, %29 : vector<16x128xf32>
    %31 = arith.truncf %30 : vector<16x128xf32> to vector<16x128xbf16>
    %c0_23 = arith.constant 0 : index
    %c0_24 = arith.constant 0 : index
    %32 = vector.load %arg10[%c0_23, %c0_24] : memref<16x128xbf16, #tpu.memory_space<vmem>>, vector<16x128xbf16>
    tpu.vector_store %arg10[%c0_23, %c0_24], %31 {strides = array<i32>} : memref<16x128xbf16, #tpu.memory_space<vmem>>, vector<16x128xbf16>,
    return
  }
  func.func @transform_0(%arg0: i32) -> (i32, i32) {
    %c0_i32 = arith.constant 0 : i32
    %c0_i32_0 = arith.constant 0 : i32
    return %arg0, %c0_i32 : i32, i32
  }
  func.func @transform_1(%arg0: i32) -> (i32, i32) {
    %c0_i32 = arith.constant 0 : i32
    %c0_i32_0 = arith.constant 0 : i32
    %c0_i32_1 = arith.constant 0 : i32
    return %c0_i32, %c0_i32_0 : i32, i32
  }
  func.func @transform_2(%arg0: i32) -> (i32, i32) {
    %c0_i32 = arith.constant 0 : i32
    %c0_i32_0 = arith.constant 0 : i32
    %c0_i32_1 = arith.constant 0 : i32
    return %c0_i32, %c0_i32_0 : i32, i32
  }
  func.func @transform_3(%arg0: i32) -> (i32, i32) {
    %c0_i32 = arith.constant 0 : i32
    %c0_i32_0 = arith.constant 0 : i32
    %c0_i32_1 = arith.constant 0 : i32
    return %c0_i32, %c0_i32_0 : i32, i32
  }
  func.func @transform_4(%arg0: i32) -> (i32, i32) {
    %c0_i32 = arith.constant 0 : i32
    %c0_i32_0 = arith.constant 0 : i32
    %c0_i32_1 = arith.constant 0 : i32
    return %c0_i32, %c0_i32_0 : i32, i32
  }
  func.func @transform_5(%arg0: i32) -> (i32, i32) {
    %c0_i32 = arith.constant 0 : i32
    %c0_i32_0 = arith.constant 0 : i32
    %c0_i32_1 = arith.constant 0 : i32
    return %c0_i32, %c0_i32_0 : i32, i32
  }
  func.func @transform_6(%arg0: i32) -> (i32, i32) {
    %c0_i32 = arith.constant 0 : i32
    %c0_i32_0 = arith.constant 0 : i32
    %c0_i32_1 = arith.constant 0 : i32
    return %c0_i32, %c0_i32_0 : i32, i32
  }
  func.func @transform_7(%arg0: i32) -> (i32, i32) {
    %c0_i32 = arith.constant 0 : i32
    %c0_i32_0 = arith.constant 0 : i32
    %c0_i32_1 = arith.constant 0 : i32
    return %c0_i32, %c0_i32_0 : i32, i32
  }
  func.func @transform_8(%arg0: i32) -> (i32, i32) {
    %c0_i32 = arith.constant 0 : i32
    %c0_i32_0 = arith.constant 0 : i32
    %c0_i32_1 = arith.constant 0 : i32
    return %c0_i32, %c0_i32_0 : i32, i32
  }
  func.func @transform_9(%arg0: i32) -> (i32, i32) {
    %c0_i32 = arith.constant 0 : i32
    %c0_i32_0 = arith.constant 0 : i32
    return %arg0, %c0_i32 : i32, i32
  }
}

</mosaic_0001>

<bundles_post_ra>
// kernel: tpu_custom_call.1
= control target key start
LH: loop header
LB: loop body
LE: loop exit
PB: predicated region body
PF: predicated region fallthrough
CT: control target
= control target key end

     0   :  { %14 = vsyncpa [#allocation3], 0  ;;  %s992_s0 = inlined_call_operand.hbm [shape: f32[16,32], index: 0, kind: input, shape index: {}]   ;;  %s993_s1 = inlined_call_operand.hbm [shape: bf16[32,128], index: 1, kind: input, shape index: {}]   ;;  %s994_s2 = inlined_call_operand.vmem [shape: f32[1,128], index: 2, kind: input, shape index: {}]   ;;  %s995_s3 = inlined_call_operand.hbm [shape: bf16[128,128], index: 3, kind: input, shape index: {}]   ;;  %s996_s4 = inlined_call_operand.vmem [shape: f32[1,128], index: 4, kind: input, shape index: {}]   ;;  %s997_s5 = inlined_call_operand.hbm [shape: bf16[128,128], index: 5, kind: input, shape index: {}]   ;;  %s998_s6 = inlined_call_operand.vmem [shape: f32[1,128], index: 6, kind: input, shape index: {}]   ;;  %s999_s7 = inlined_call_operand.hbm [shape: bf16[128,128], index: 7, kind: input, shape index: {}]   ;;  %s1000_s8 = inlined_call_operand.vmem [shape: f32[1,128], index: 8, kind: input, shape index: {}]   ;;  %s1001_s9 = inlined_call_operand.hbm [shape: bf16[16,128], index: 9, kind: output, shape index: {}]  }
   0x1   :  { %15 = vsyncpa [#allocation6], 0 }
   0x2   :  { %16 = vsyncpa [#allocation9], 0 }
   0x3   :  { %17 = vsyncpa [#allocation4], 0  ;;  %s851_s30 = smov [#allocation5]  }
   0x4   :  { %s35_s10 = sshll.u32 %s851_s30, 4  ;;  %s36_s10 = int_to_ptr.vmem [resolvable:$true] %s35_s10 }
   0x5   :  { %s731_s11 = scalar_lea.vmem %s36_s10, 256  ;;  %p736_p1 = scmp.lt.s32.totalorder %s36_s10, %s36_s10 }
   0x6   :  { %p732_p0 = scmp.ne.s32.totalorder %s36_s10, %s731_s11  ;;  %p737_p2 = scmp.lt.s32.totalorder %s731_s11, %s731_s11 }
   0x8   :  { %p738_p3 = por %p737_p2, %p736_p1 }
   0xa   :  { %p739_p4 = pnand %p738_p3, %p732_p0 }
   0xc   :  { %742 = shalt.err (!%p739_p4)
}
   0xd   :  { %s852_s12 = smov 64   ;;  %s853_s13 = smov 4  }
   0xe   :  { %41 = dma.hbm_to_vmem [thread:$0]  %s993_s1, 256, %s36_s10, [#allocation6], %s852_s12, %s852_s12, %s853_s13  }
   0xf   :  { %s854_s16 = smov [#allocation8]   ;;  %s855_s18 = smov [#allocation2]  }
  0x10   :  { %s63_s17 = sshll.u32 %s854_s16, 4  ;;  %s23_s19 = sshll.u32 %s855_s18, 4  ;;  %s64_s17 = int_to_ptr.vmem [resolvable:$true] %s63_s17  ;;  %s24_s19 = int_to_ptr.vmem [resolvable:$true] %s23_s19 }
  0x11   :  { %s751_s20 = scalar_lea.vmem %s64_s17, 1024  ;;  %p756_p6 = scmp.lt.s32.totalorder %s64_s17, %s64_s17 }
  0x12   :  { %p752_p5 = scmp.ne.s32.totalorder %s64_s17, %s751_s20  ;;  %p757_p7 = scmp.lt.s32.totalorder %s751_s20, %s751_s20 }
  0x14   :  { %p758_p8 = por %p757_p7, %p756_p6 }
  0x16   :  { %p759_p9 = pnand %p758_p8, %p752_p5 }
  0x18   :  { %762 = shalt.err (!%p759_p9)
}
  0x19   :  { %69 = dma.hbm_to_vmem [thread:$0]  %s997_s5, 1024, %s64_s17, [#allocation9], %s852_s12, %s852_s12, %s853_s13  }
  0x1a   :  { %s771_s1 = scalar_lea.vmem %s24_s19, 256  ;;  %p776_p11 = scmp.lt.s32.totalorder %s24_s19, %s24_s19 }
  0x1b   :  { %p772_p10 = scmp.ne.s32.totalorder %s24_s19, %s771_s1  ;;  %p777_p12 = scmp.lt.s32.totalorder %s771_s1, %s771_s1 }
  0x1d   :  { %p778_p13 = por %p777_p12, %p776_p11 }
  0x1f   :  { %p779_p0 = pnand %p778_p13, %p772_p10 }
  0x21   :  { %782 = shalt.err (!%p779_p0)
}
  0x22   :  { %s856_s23 = smov 128   ;;  %s857_s24 = smov 8  }
  0x23   :  { %29 = dma.hbm_to_vmem [thread:$0]  %s992_s0, 256, %s24_s19, [#allocation3], %s856_s23, %s856_s23, %s857_s24  }
  0x24   :  { %s858_s27 = smov [#allocation7]   ;;  %s859_s29 = smov [#allocation10]  }
  0x25   :  { %s49_s28 = sshll.u32 %s858_s27, 4  ;;  %s77_s30 = sshll.u32 %s859_s29, 4  ;;  %s50_s28 = int_to_ptr.vmem [resolvable:$true] %s49_s28  ;;  %s78_s30 = int_to_ptr.vmem [resolvable:$true] %s77_s30 }
  0x26   :  { %s791_s5 = scalar_lea.vmem %s50_s28, 1024  ;;  %p796_p2 = scmp.lt.s32.totalorder %s50_s28, %s50_s28 }
  0x27   :  { %p792_p1 = scmp.ne.s32.totalorder %s50_s28, %s791_s5  ;;  %p797_p3 = scmp.lt.s32.totalorder %s791_s5, %s791_s5 }
  0x29   :  { %p798_p4 = por %p797_p3, %p796_p2 }
  0x2b   :  { %p799_p5 = pnand %p798_p4, %p792_p1 }
  0x2d   :  { %802 = shalt.err (!%p799_p5)
}
  0x2e   :  { %55 = dma.hbm_to_vmem [thread:$0]  %s995_s3, 1024, %s50_s28, [#allocation6], %s852_s12, %s852_s12, %s853_s13  }
  0x2f   :  { %s811_s0 = scalar_lea.vmem %s78_s30, 1024  ;;  %p816_p7 = scmp.lt.s32.totalorder %s78_s30, %s78_s30 }
  0x30   :  { %p812_p6 = scmp.ne.s32.totalorder %s78_s30, %s811_s0  ;;  %p817_p8 = scmp.lt.s32.totalorder %s811_s0, %s811_s0 }
  0x32   :  { %p818_p9 = por %p817_p8, %p816_p7 }
  0x34   :  { %p819_p10 = pnand %p818_p9, %p812_p6 }
  0x36   :  { %822 = shalt.err (!%p819_p10)
}
  0x37   :  { %83 = dma.hbm_to_vmem [thread:$0]  %s999_s7, 1024, %s78_s30, [#allocation9], %s852_s12, %s852_s12, %s853_s13  }
  0x38   :  { %843 = dma.done.wait [#allocation3], 256  }
  0x39   :  { %844 = vsyncadd [#allocation3], 4294967040 }
  0x3a   :  { %845 = dma.done.wait [#allocation6], 1280  }
  0x3b   :  { %846 = vsyncadd [#allocation6], 4294966016 }
  0x3c   :  { %847 = dma.done.wait [#allocation9], 2048  }
  0x3d   :  { %848 = vsyncadd [#allocation9], 4294965248  ;;  %v860_v0 = vmov 0.0   ;;  %vm861_vm0 = vmmov 0   ;;  %v697_v1 = vld [vmem:[#allocation5 + $0x8] sm:$0xff]   ;;  %v698_v2 = vld [vmem:[#allocation5] sm:$0xff]  }
  0x3e   :  { %617 = vmatprep.subr.bf16.mxu0 %v860_v0  ;;  %621 = vmatprep.mubr.msk.bf16.mxu0 %vm861_vm0, %v860_v0  ;;  %v102_v3 = vld [vmem:[#allocation2] sm:$0xff]  ;;  %v103_v4 = vld [vmem:[#allocation2 + $0x8] sm:$0xff]  ;;  %v699_v5 = vld [vmem:[#allocation7 + $0x38] sm:$0xff]   ;;  %vm128_vm1 = vcmask 261120   ;;  %s862_s20 = smov [#allocation11]  }
  0x3f   :  { %625 = vmatprep.subr.bf16.mxu1 %v860_v0  ;;  %641 = vmatprep.mubr.msk.bf16.mxu1 %vm861_vm0, %v860_v0  ;;  %v104_v6 = vpack.c.bf16 %v103_v4, %v102_v3  ;;  %v700_v7 = vld [vmem:[#allocation7 + $0x30] sm:$0xff]   ;;  %v701_v8 = vld [vmem:[#allocation7 + $0x28] sm:$0xff]   ;;  %v702_v9 = vld [vmem:[#allocation7 + $0x20] sm:$0xff]   ;;  %s533_s21 = sshll.u32 %s862_s20, 4  ;;  %s534_s21 = int_to_ptr.vmem [resolvable:$true] %s533_s21 }
  0x40   :  { %618 = vmatpush3.bf16.msra.mxu0 %v697_v1  ;;  %626 = vmatpush3.bf16.msra.mxu1 %v699_v5  ;;  %v703_v10 = vld [vmem:[#allocation7 + $0x18] sm:$0xff]   ;;  %v704_v11 = vld [vmem:[#allocation7 + $0x10] sm:$0xff]   ;;  %v705_v12 = vld [vmem:[#allocation7 + $0x8] sm:$0xff]   ;;  %p828_p12 = scmp.lt.s32.totalorder %s534_s21, %s534_s21 }
  0x41   :  { %619 = vmatprep.subr.bf16.mxu0 %v860_v0  ;;  %627 = vmatprep.subr.bf16.mxu1 %v860_v0  ;;  %v706_v13 = vld [vmem:[#allocation7] sm:$0xff]   ;;  %v707_v14 = vld [vmem:[#allocation8 + $0x38] sm:$0xff]   ;;  %v708_v15 = vld [vmem:[#allocation8 + $0x30] sm:$0xff]  }
  0x42   :  { %v709_v16 = vld [vmem:[#allocation8 + $0x28] sm:$0xff]   ;;  %v710_v17 = vld [vmem:[#allocation8 + $0x20] sm:$0xff]   ;;  %v711_v18 = vld [vmem:[#allocation8 + $0x18] sm:$0xff]  }
  0x43   :  { %v547_v19 = vld [vmem:[%s994_s2] ss:$0 sm:$0xff]  ;;  %v712_v29 = vld [vmem:[#allocation8 + $0x10] sm:$0xff]   ;;  %v713_v30 = vld [vmem:[#allocation8 + $0x8] sm:$0xff]  }
  0x44   :  { %620 = vmatpush3.bf16.msra.mxu0 %v698_v2  ;;  %628 = vmatpush3.bf16.msra.mxu1 %v700_v7  ;;  %v714_v31 = vld [vmem:[#allocation8] sm:$0xff]   ;;  %v715_v32 = vld [vmem:[#allocation10 + $0x38] sm:$0xff]   ;;  %v716_v33 = vld [vmem:[#allocation10 + $0x30] sm:$0xff]  }
  0x45   :  { %645 = vmatprep.subr.bf16.mxu0 %v860_v0  ;;  %629 = vmatprep.subr.bf16.mxu1 %v860_v0  ;;  %v717_v34 = vld [vmem:[#allocation10 + $0x28] sm:$0xff]   ;;  %v718_v35 = vld [vmem:[#allocation10 + $0x20] sm:$0xff]   ;;  %v719_v36 = vld [vmem:[#allocation10 + $0x18] sm:$0xff]  }
  0x46   :  { %v551_v37 = vld [vmem:[%s996_s4] ss:$0 sm:$0xff]  ;;  %v720_v47 = vld [vmem:[#allocation10 + $0x10] sm:$0xff]   ;;  %v721_v48 = vld [vmem:[#allocation10 + $0x8] sm:$0xff]  }
  0x47   :  { %622 = vmatmul.mubr.msk.bf16.vlgmr.msra.gmra.mxu0 %vm128_vm1, %v104_v6  ;;  %v722_v49 = vld [vmem:[#allocation10] sm:$0xff]  }
  0x48   :  { %661 = vmatprep.mubr.msk.bf16.mxu0 %vm861_vm0, %v860_v0  ;;  %630 = vmatpush3.bf16.msra.mxu1 %v701_v8  ;;  %v560_v50 = vld [vmem:[%s998_s6] ss:$0 sm:$0xff]  ;;  %s823_s6 = scalar_lea.vmem %s534_s21, 128 }
  0x49   :  { %631 = vmatprep.subr.bf16.mxu1 %v860_v0  ;;  %646 = vmatpush3.bf16.msra.mxu0 %v707_v14  ;;  %v569_v61 = vld [vmem:[%s1000_s8] ss:$0 sm:$0xff]  ;;  %p824_p11 = scmp.ne.s32.totalorder %s534_s21, %s823_s6  ;;  %p829_p13 = scmp.lt.s32.totalorder %s823_s6, %s823_s6 }
  0x4a   :  { %647 = vmatprep.subr.bf16.mxu0 %v860_v0 }
  0x4b   :  { %p830_p0 = por %p829_p13, %p828_p12 }
  0x4c   :  { %632 = vmatpush3.bf16.msra.mxu1 %v702_v9 }
  0x4d   :  { %633 = vmatprep.subr.bf16.mxu1 %v860_v0  ;;  %648 = vmatpush3.bf16.msra.mxu0 %v708_v15  ;;  %p831_p1 = pnand %p830_p0, %p824_p11 }
  0x4e   :  { %649 = vmatprep.subr.bf16.mxu0 %v860_v0 }
  0x50   :  { %634 = vmatpush3.bf16.msra.mxu1 %v703_v10 }
  0x51   :  { %635 = vmatprep.subr.bf16.mxu1 %v860_v0  ;;  %650 = vmatpush3.bf16.msra.mxu0 %v709_v16 }
  0x52   :  { %651 = vmatprep.subr.bf16.mxu0 %v860_v0 }
  0x54   :  { %636 = vmatpush3.bf16.msra.mxu1 %v704_v11 }
  0x55   :  { %637 = vmatprep.subr.bf16.mxu1 %v860_v0  ;;  %652 = vmatpush3.bf16.msra.mxu0 %v710_v17 }
  0x56   :  { %653 = vmatprep.subr.bf16.mxu0 %v860_v0 }
  0x58   :  { %638 = vmatpush3.bf16.msra.mxu1 %v705_v12 }
  0x59   :  { %639 = vmatprep.subr.bf16.mxu1 %v860_v0  ;;  %654 = vmatpush3.bf16.msra.mxu0 %v711_v18 }
  0x5a   :  { %655 = vmatprep.subr.bf16.mxu0 %v860_v0 }
  0x5c   :  { %640 = vmatpush3.bf16.msra.mxu1 %v706_v13 }
  0x5d   :  { %665 = vmatprep.subr.bf16.mxu1 %v860_v0  ;;  %656 = vmatpush3.bf16.msra.mxu0 %v712_v29 }
  0x5e   :  { %657 = vmatprep.subr.bf16.mxu0 %v860_v0 }
  0x61   :  { %658 = vmatpush3.bf16.msra.mxu0 %v713_v30 }
  0x62   :  { %659 = vmatprep.subr.bf16.mxu0 %v860_v0 }
  0x65   :  { %660 = vmatpush3.bf16.msra.mxu0 %v714_v31 }
 0x107   :  { %v166_v20 = vpop.f32.mrf.mxu0 }
 0x108   :  { %v167_v22 = vadd.f32 %v547_v19, %v166_v20 }
 0x109   :  { %v623_v21 = vpop.f32.mrf.mxu0 }
 0x10a   :  { %v173_v26 = vmax.f32 %v167_v22, 0.0 }
 0x10b   :  { %v169_v23 = vpop.f32.mrf.mxu0 }
 0x10c   :  { %v170_v24 = vadd.f32 %v547_v19, %v169_v23 }
 0x10d   :  { %v624_v25 = vpop.f32.mrf.mxu0 }
 0x10e   :  { %v174_v27 = vmax.f32 %v170_v24, 0.0 }
 0x110   :  { %v175_v28 = vpack.c.bf16 %v174_v27, %v173_v26 }
 0x112   :  { %642 = vmatmul.mubr.bf16.vlgmr.msra.gmra.mxu1 %v175_v28 }
 0x113   :  { %681 = vmatprep.mubr.msk.bf16.mxu1 %vm861_vm0, %v860_v0  ;;  %666 = vmatpush3.bf16.msra.mxu1 %v715_v32 }
 0x114   :  { %667 = vmatprep.subr.bf16.mxu1 %v860_v0 }
 0x117   :  { %668 = vmatpush3.bf16.msra.mxu1 %v716_v33 }
 0x118   :  { %669 = vmatprep.subr.bf16.mxu1 %v860_v0 }
 0x11b   :  { %670 = vmatpush3.bf16.msra.mxu1 %v717_v34 }
 0x11c   :  { %671 = vmatprep.subr.bf16.mxu1 %v860_v0 }
 0x11f   :  { %672 = vmatpush3.bf16.msra.mxu1 %v718_v35 }
 0x120   :  { %673 = vmatprep.subr.bf16.mxu1 %v860_v0 }
 0x123   :  { %674 = vmatpush3.bf16.msra.mxu1 %v719_v36 }
 0x124   :  { %675 = vmatprep.subr.bf16.mxu1 %v860_v0 }
 0x127   :  { %676 = vmatpush3.bf16.msra.mxu1 %v720_v47 }
 0x128   :  { %677 = vmatprep.subr.bf16.mxu1 %v860_v0 }
 0x12b   :  { %678 = vmatpush3.bf16.msra.mxu1 %v721_v48 }
 0x12c   :  { %679 = vmatprep.subr.bf16.mxu1 %v860_v0 }
 0x12f   :  { %680 = vmatpush3.bf16.msra.mxu1 %v722_v49 }
 0x1d2   :  { %v281_v38 = vpop.f32.mrf.mxu1 }
 0x1d3   :  { %v282_v40 = vadd.f32 %v551_v37, %v281_v38 }
 0x1d4   :  { %v643_v39 = vpop.f32.mrf.mxu1 }
 0x1d5   :  { %v288_v44 = vmax.f32 %v282_v40, 0.0 }
 0x1d6   :  { %v284_v41 = vpop.f32.mrf.mxu1 }
 0x1d7   :  { %v285_v42 = vadd.f32 %v551_v37, %v284_v41 }
 0x1d8   :  { %v644_v43 = vpop.f32.mrf.mxu1 }
 0x1d9   :  { %v289_v45 = vmax.f32 %v285_v42, 0.0 }
 0x1db   :  { %v290_v46 = vpack.c.bf16 %v289_v45, %v288_v44 }
 0x1dd   :  { %662 = vmatmul.mubr.bf16.vlgmr.msra.gmra.mxu0 %v290_v46 }
 0x29d   :  { %v396_v51 = vpop.f32.mrf.mxu0 }
 0x29e   :  { %v397_v53 = vadd.f32 %v560_v50, %v396_v51 }
 0x29f   :  { %v663_v52 = vpop.f32.mrf.mxu0 }
 0x2a0   :  { %v403_v57 = vmax.f32 %v397_v53, 0.0 }
 0x2a1   :  { %v399_v54 = vpop.f32.mrf.mxu0 }
 0x2a2   :  { %v400_v55 = vadd.f32 %v560_v50, %v399_v54 }
 0x2a3   :  { %v664_v56 = vpop.f32.mrf.mxu0 }
 0x2a4   :  { %v404_v58 = vmax.f32 %v400_v55, 0.0 }
 0x2a6   :  { %v405_v59 = vpack.c.bf16 %v404_v58, %v403_v57 }
 0x2a8   :  { %682 = vmatmul.mubr.bf16.vlgmr.msra.gmra.mxu1 %v405_v59 }
 0x368   :  { %v511_v60 = vpop.f32.mrf.mxu1 }
 0x369   :  { %v512_v0 = vadd.f32 %v569_v61, %v511_v60 }
 0x36a   :  { %v683_v62 = vpop.f32.mrf.mxu1 }
 0x36c   :  { %v514_v63 = vpop.f32.mrf.mxu1 }
 0x36d   :  { %v515_v1 = vadd.f32 %v569_v61, %v514_v63 }
 0x36e   :  { %v684_v2 = vpop.f32.mrf.mxu1 }
 0x36f   :  { %v585_v3 = vpack.c.bf16 %v515_v1, %v512_v0 }
 0x371   :  { %586 = vst [vmem:[#allocation11] sm:$0xff] %v585_v3  }
 0x372   :  { %834 = shalt.err (!%p831_p1)
}
 0x373   :  { %539 = dma.vmem_to_hbm [thread:$0]  %s534_s21, 128, %s1001_s9, [#allocation4], %s852_s12, %s852_s12, %s853_s13  }
 0x374   :  { %849 = dma.done.wait [#allocation4], 128  }
 0x375   :  { %850 = vsyncadd [#allocation4], 4294967168 }
 0x376   :  { %543 = vsyncpa [#allocation3], 1 }
 0x377   :  { %544 = vsyncpa [#allocation6], 1 }
 0x378   :  { %545 = vsyncpa [#allocation9], 1 }
 0x379   :  { %546 = vsyncpa [#allocation4], 1 }

</bundles_post_ra>
